<compile_context>
chip_gen: v6e
topology: v6e:2x2x1
jax: 0.10.0
libtpu: 0.0.40
codegen_flags: <defaults>
</compile_context>

<pallas_src>
import math

import numpy as np
import jax
import jax.numpy as jnp
from jax.experimental import pallas as pl
from jax.experimental.pallas import tpu as pltpu


def _round_up(x: int, m: int) -> int:
    return ((x + m - 1) // m) * m


def _freq_phase_table(dim: int, dim_pad: int) -> np.ndarray:
    """Compile-time constant (2, dim_pad) table.

    Row 0: [freqs, freqs, 0-pad]   Row 1: [0, pi/2, 0-pad]
    so that sin(t*row0 + row1) == [sin(t*f), cos(t*f), 0...].
    """
    half = dim // 2
    # Guard dim == 2 (PyTorch reference divides by zero there) -- deliberate
    # behavioral difference, documented.
    denom = max(half - 1, 1)
    scale = math.log(10000.0) / denom
    freqs = np.exp(np.arange(half, dtype=np.float64) * -scale).astype(np.float32)

    freq_full = np.zeros(dim_pad, np.float32)
    phase = np.zeros(dim_pad, np.float32)
    freq_full[:half] = freqs
    freq_full[half:dim] = freqs
    phase[half:dim] = np.pi / 2.0
    return np.stack([freq_full, phase], axis=0)  # (2, dim_pad)


def _time_embedding_kernel(t_ref, tab_ref, o_ref):
    # t_ref:   (TB, 1)       f32 -- per-row timestep
    # tab_ref: (2, dim_pad)  f32 -- row 0: frequencies, row 1: phases
    # o_ref:   (TB, dim_pad)
    t = t_ref[...]                   # (TB, 1)
    freq = tab_ref[0:1, :]           # (1, dim_pad)
    phase = tab_ref[1:2, :]          # (1, dim_pad)
    # cos(x) = sin(x + pi/2): one lane-dense sin, one full-width unmasked store.
    o_ref[...] = jnp.sin(t * freq + phase).astype(o_ref.dtype)


def time_embedding(
    time: jax.Array,
    dim: int,
    *,
    block_b: int = 2048,
    out_dtype=jnp.float32,
    return_lane_padded: bool = False,
) -> jax.Array:
    """JAX/Pallas equivalent of TimeEmbedding(dim).forward(time).

    Args:
      time: (B,) timesteps (any float/int dtype).
      dim:  embedding dimension (even).
      block_b: max batch rows per grid block.
      out_dtype: output dtype (float32 matches the PyTorch module; bfloat16 halves
        the only meaningful HBM traffic if the consumer accepts it).
      return_lane_padded: if True, return (B, round_up(dim,128)) with zero-filled
        tail lanes (no slice copy) for a fused consumer.
    Returns:
      (B, dim) (or padded) embedding: concat(sin, cos) along the last axis.
    """
    assert dim % 2 == 0, "dim must be even"
    b = time.shape[0]
    dim_pad = _round_up(dim, 128)

    table = jnp.asarray(_freq_phase_table(dim, dim_pad))  # (2, dim_pad) f32

    # --- batch tile selection -------------------------------------------------
    tb = min(block_b, _round_up(b, 8))
    # v7x: keep >= 2 batch blocks when B is large so the "parallel" axis shards
    # across both TensorCores (harmless on v5e/v6e).
    if b > 1024 and b <= tb:
        tb = _round_up(pl.cdiv(b, 2), 8)
    # Cap the output block at ~12 MiB so double-buffered blocks fit the default
    # 32 MiB scoped VMEM on all generations (v5e/v6e/v7x) without raising limits.
    max_block_rows = max(8, ((12 * 1024 * 1024) // (dim_pad * 4)) // 8 * 8)
    tb = min(tb, max_block_rows)
    grid_b = pl.cdiv(b, tb)  # partial trailing block: no batch pad, no out[:b] copy

    t2d = time.astype(jnp.float32).reshape(b, 1)

    out = pl.pallas_call(
        _time_embedding_kernel,
        out_shape=jax.ShapeDtypeStruct((b, dim_pad), out_dtype),
        grid=(grid_b,),
        in_specs=[
            pl.BlockSpec((tb, 1), lambda i: (i, 0)),        # timesteps, per-block
            pl.BlockSpec((2, dim_pad), lambda i: (0, 0)),   # constant freq/phase table
        ],
        out_specs=pl.BlockSpec((tb, dim_pad), lambda i: (i, 0)),
        compiler_params=pltpu.CompilerParams(
            dimension_semantics=("parallel",),
        ),
    )(t2d, table)

    if return_lane_padded or dim_pad == dim:
        return out
    return out[:, :dim]


def _reference(time: jax.Array, dim: int) -> jax.Array:
    """Pure-JAX reference mirroring the PyTorch forward (explicit sin/cos concat)."""
    half = dim // 2
    denom = max(half - 1, 1)
    scale = math.log(10000.0) / denom
    freqs = np.exp(np.arange(half, dtype=np.float64) * -scale).astype(np.float32)
    emb = time.astype(jnp.float32)[:, None] * jnp.asarray(freqs)[None, :]
    return jnp.concatenate([jnp.sin(emb), jnp.cos(emb)], axis=-1)


if __name__ == "__main__":
    key = jax.random.PRNGKey(0)

    # (B=8, dim=64): exercises lane-padding of the 64-wide embedding to 128 lanes.
    # (B=5, dim=128): ragged batch (partial trailing block) + already lane-dense dim
    #                 (no slice copy anywhere on this path).
    for B, DIM in ((8, 64), (5, 128)):
        t = jax.random.randint(key, (B,), minval=0, maxval=1000).astype(jnp.float32)
        out = jax.block_until_ready(time_embedding(t, DIM))
        ref = _reference(t, DIM)
        assert out.shape == (B, DIM), out.shape
        assert out.dtype == jnp.float32, out.dtype
        # Arguments to sin/cos reach ~1e3; f32 range reduction in the in-kernel
        # transcendental vs XLA differs by up to a few 1e-4 absolute, and the
        # cos-via-sin(x+pi/2) trick adds ~|t*f|*eps argument rounding. Outputs are
        # bounded in [-1, 1], so 5e-3 absolute is still a strict functional check.
        assert jnp.allclose(out, ref, atol=5e-3, rtol=0.0), "mismatch vs reference"

    # bf16 output path (consumer-permitting fast path).
    B, DIM = 8, 64
    t = jax.random.randint(key, (B,), minval=0, maxval=1000).astype(jnp.float32)
    ref = _reference(t, DIM)
    out_bf16 = jax.block_until_ready(time_embedding(t, DIM, out_dtype=jnp.bfloat16))
    assert out_bf16.shape == (B, DIM) and out_bf16.dtype == jnp.bfloat16
    assert jnp.allclose(out_bf16.astype(jnp.float32), ref, atol=2e-2, rtol=0.0)

    print("KERNEL_OK")
</pallas_src>

<mosaic_0001>
module attributes {stable_mosaic.version = 11 : i64} {
  func.func @_time_embedding_kernel(%arg0: i32, %arg1: memref<8x1xf32, #tpu.memory_space<vmem>>, %arg2: memref<2x128xf32, #tpu.memory_space<vmem>>, %arg3: memref<8x128xf32, #tpu.memory_space<vmem>>) attributes {dimension_semantics = [#tpu.dimension_semantics<parallel>], iteration_bounds = array<i64: 1>, scalar_prefetch = 0 : i64, scratch_operands = 0 : i64, tpu.core_type = #tpu.core_type<tc>, window_params = [{transform_indices = @transform_0, window_bounds = array<i64: 8, 1>}, {pipeline_mode = #tpu.pipeline_mode<synchronous>, transform_indices = @transform_1, window_bounds = array<i64: 2, 128>}, {transform_indices = @transform_2, window_bounds = array<i64: 8, 128>}]} {
    %c0 = arith.constant 0 : index
    %c0_0 = arith.constant 0 : index
    %0 = vector.load %arg1[%c0, %c0_0] : memref<8x1xf32, #tpu.memory_space<vmem>>, vector<8x1xf32>
    %c0_1 = arith.constant 0 : index
    %c0_2 = arith.constant 0 : index
    %1 = vector.load %arg2[%c0_1, %c0_2] : memref<2x128xf32, #tpu.memory_space<vmem>>, vector<1x128xf32>
    %c1 = arith.constant 1 : index
    %c0_3 = arith.constant 0 : index
    %2 = vector.load %arg2[%c1, %c0_3] : memref<2x128xf32, #tpu.memory_space<vmem>>, vector<1x128xf32>
    %3 = vector.broadcast %0 : vector<8x1xf32> to vector<8x128xf32>
    %4 = vector.broadcast %1 : vector<1x128xf32> to vector<8x128xf32>
    %5 = arith.mulf %3, %4 : vector<8x128xf32>
    %6 = vector.broadcast %2 : vector<1x128xf32> to vector<8x128xf32>
    %7 = arith.addf %5, %6 : vector<8x128xf32>
    %8 = math.sin %7 : vector<8x128xf32>
    %c0_4 = arith.constant 0 : index
    %c0_5 = arith.constant 0 : index
    %9 = vector.load %arg3[%c0_4, %c0_5] : memref<8x128xf32, #tpu.memory_space<vmem>>, vector<8x128xf32>
    tpu.vector_store %arg3[%c0_4, %c0_5], %8 {strides = array<i32>} : memref<8x128xf32, #tpu.memory_space<vmem>>, vector<8x128xf32>,
    return
  }
  func.func @transform_0(%arg0: i32) -> (i32, i32) {
    %c0_i32 = arith.constant 0 : i32
    %c0_i32_0 = arith.constant 0 : i32
    return %arg0, %c0_i32 : i32, i32
  }
  func.func @transform_1(%arg0: i32) -> (i32, i32) {
    %c0_i32 = arith.constant 0 : i32
    %c0_i32_0 = arith.constant 0 : i32
    %c0_i32_1 = arith.constant 0 : i32
    return %c0_i32, %c0_i32_0 : i32, i32
  }
  func.func @transform_2(%arg0: i32) -> (i32, i32) {
    %c0_i32 = arith.constant 0 : i32
    %c0_i32_0 = arith.constant 0 : i32
    return %arg0, %c0_i32 : i32, i32
  }
}

</mosaic_0001>

<bundles_post_ra>
// kernel: tpu_custom_call.1
= control target key start
LH: loop header
LB: loop body
LE: loop exit
PB: predicated region body
PF: predicated region fallthrough
CT: control target
= control target key end

     0   :  { %v194_v1 = vmov 0   ;;  %s250_s0 = inlined_call_operand.vmem [shape: f32[8,1], index: 0, kind: input, shape index: {}]   ;;  %s251_s1 = inlined_call_operand.vmem [shape: f32[2,128], index: 1, kind: input, shape index: {}]   ;;  %s252_s2 = inlined_call_operand.hbm [shape: f32[8,128], index: 2, kind: output, shape index: {}]  }
   0x1   :  { %v12_v0 = vld [vmem:[%s250_s0] sm:$0xff]  ;;  %167 = vset.pattern.permute.xlu0 %v194_v1 }
   0x2   :  { %17 = vperm.xlu0 %167, %v12_v0  }
   0x3   :  { %7 = vsyncpa [#allocation3], 0  ;;  %v149_v2 = vld [vmem:[%s251_s1] ss:$0 sm:$0xff]  ;;  %v150_v3 = vld [vmem:[%s251_s1 + $0x1] ss:$0 sm:$0xff] }
   0x4   :  { %v195_v18 = vmov 2102212464   ;;  %v196_v20 = vmov 920167782   ;;  %v197_v24 = vmov 1326507024  }
   0x5   :  { %v198_v26 = vmov 683565275   ;;  %v199_v28 = vmov 2475754826   ;;  %v200_v31 = vmov 2131351028  }
   0x6   :  { %s201_s0 = smov [#allocation2]  }
   0x7   :  { %s141_s1 = sshll.u32 %s201_s0, 4  ;;  %s142_s1 = int_to_ptr.vmem [resolvable:$true] %s141_s1 }
   0x8   :  { %s172_s15 = scalar_lea.vmem %s142_s1, 128  ;;  %p177_p1 = scmp.lt.s32.totalorder %s142_s1, %s142_s1 }
   0x9   :  { %p173_p0 = scmp.ne.s32.totalorder %s142_s1, %s172_s15  ;;  %p178_p2 = scmp.lt.s32.totalorder %s172_s15, %s172_s15 }
   0xb   :  { %p179_p3 = por %p178_p2, %p177_p1 }
   0xd   :  { %p180_p4 = pnand %p179_p3, %p173_p0 }
  0x7d   :  { %v18_v4 = vpop.permute.xlu0 %17 }
  0x7e   :  { %v24_v5 = vmul.f32 %v149_v2, %v18_v4 }
  0x80   :  { %v226_v6 = vadd.f32 %v150_v3, %v24_v5 }
  0x82   :  { %v33_v7 = vand.u32 2139095040, %v226_v6  ;;  %v30_v8 = vand.u32 2147483647, %v226_v6  ;;  %vm32_vm7 = vcmp.lt.s32.totalorder %v226_v6, 0  ;;  %vm122_vm12 = vweird.f32 %v226_v6 }
  0x84   :  { %v34_v9 = vshrl.u32 %v33_v7, 23  ;;  %v37_v11 = vand.u32 8388607, %v30_v8  ;;  %vm31_vm8 = vcmp.le.f32.partialorder %v30_v8, 0.7853982 }
  0x86   :  { %v151_v10 = vadd.s32 4294967169, %v34_v9  ;;  %v38_v14 = vor.u32 8388608, %v37_v11 }
  0x88   :  { %v40_v12 = vadd.s32 1, %v151_v10  ;;  %v78_v22 = vshll.u32 %v38_v14, 8 }
  0x8a   :  { %vm41_vm0 = vcmp.gt.s32.totalorder %v40_v12, 0 }
  0x8b   :  { %v42_v13 = vsel %vm41_vm0, %v40_v12, 0 }
  0x8c   :  { %v44_v15 = vand.u32 31, %v42_v13  ;;  %v43_v16 = vshrl.u32 %v42_v13, 5 }
  0x8e   :  { %v45_v17 = vsub.s32 32, %v44_v15  ;;  %v56_v19 = vshll.u32 %v195_v18, %v44_v15  ;;  %v59_v21 = vshll.u32 %v196_v20, %v44_v15  ;;  %v47_v27 = vshll.u32 %v198_v26, %v44_v15 }
  0x8f   :  { %v50_v30 = vshll.u32 %v199_v28, %v44_v15  ;;  %v53_v33 = vshll.u32 %v200_v31, %v44_v15  ;;  %vm65_vm1 = vcmp.lt.s32.totalorder %v43_v16, 4  ;;  %vm62_vm2 = vcmp.lt.s32.totalorder %v43_v16, 1 }
  0x90   :  { %v57_v23 = vshrl.u32 %v196_v20, %v45_v17  ;;  %v60_v25 = vshrl.u32 %v197_v24, %v45_v17  ;;  %v48_v29 = vshrl.u32 %v199_v28, %v45_v17  ;;  %v51_v32 = vshrl.u32 %v200_v31, %v45_v17 }
  0x91   :  { %v54_v34 = vshrl.u32 %v195_v18, %v45_v17  ;;  %v46_v38 = vshrl.u32 %v198_v26, %v45_v17  ;;  %vm63_vm3 = vcmp.lt.s32.totalorder %v43_v16, 2  ;;  %vm64_vm4 = vcmp.lt.s32.totalorder %v43_v16, 3 }
  0x92   :  { %v58_v35 = vor.u32 %v57_v23, %v56_v19  ;;  %v61_v36 = vor.u32 %v60_v25, %v59_v21  ;;  %v49_v37 = vor.u32 %v48_v29, %v47_v27  ;;  %v52_v39 = vor.u32 %v51_v32, %v50_v30 }
  0x93   :  { %v55_v40 = vor.u32 %v54_v34, %v53_v33 }
  0x94   :  { %v71_v41 = vsel %vm65_vm1, %v58_v35, 920167782  ;;  %v75_v42 = vsel %vm65_vm1, %v61_v36, 1326507024  ;;  %v70_v44 = vsel %vm62_vm2, %v49_v37, %v52_v39  ;;  %v66_v47 = vsel %vm62_vm2, %v46_v38, %v49_v37 }
  0x95   :  { %v67_v43 = vsel %vm65_vm1, %v55_v40, 2102212464  ;;  %v72_v45 = vsel %vm64_vm4, %v55_v40, %v71_v41  ;;  %v74_v46 = vsel %vm62_vm2, %v52_v39, %v55_v40  ;;  %v76_v50 = vsel %vm64_vm4, %v58_v35, %v75_v42 }
  0x96   :  { %v68_v48 = vsel %vm64_vm4, %v52_v39, %v67_v43  ;;  %v73_v49 = vsel %vm63_vm3, %v70_v44, %v72_v45  ;;  %v77_v51 = vsel %vm63_vm3, %v74_v46, %v76_v50 }
  0x97   :  { %v232_v52 = vmul.u32.u64.low %v78_v22, %v73_v49  ;;  %v233_v53 = vmul.u32.u64.high %v78_v22, %v73_v49, %v232_v52  ;;  %v235_v54 = vmul.u32.u64.low %v78_v22, %v77_v51  ;;  %v236_v55 = vmul.u32.u64.high %v78_v22, %v77_v51, %v235_v54 }
  0x98   :  { %v69_v56 = vsel %vm63_vm3, %v66_v47, %v68_v48 }
  0x99   :  { %v88_v57 = vadd.s32 1, %v233_v53  ;;  %v85_v58 = vmul.u32 %v78_v22, %v69_v56  ;;  %vm87_vm5 = vc.u32 %v236_v55, %v232_v52  ;;  %v86_v7 = vadd.s32 %v232_v52, %v236_v55 }
  0x9b   :  { %v89_v59 = vsel %vm87_vm5, %v88_v57, %v233_v53 }
  0x9c   :  { %v90_v60 = vadd.s32 %v89_v59, %v85_v58 }
  0x9e   :  { %v91_v61 = vadd.s32 536870912, %v90_v60 }
  0xa0   :  { %v92_v62 = vshrl.u32 %v91_v61, 30 }
  0xa2   :  { %v93_v63 = vshll.u32 %v92_v62, 30  ;;  %v116_v21 = vsub.s32 4, %v92_v62 }
  0xa4   :  { %v94_v0 = vsub.s32 %v90_v60, %v93_v63  ;;  %v117_v24 = vsel %vm32_vm7, %v116_v21, %v92_v62 }
  0xa5   :  { %v119_v25 = vsel %vm31_vm8, 0, %v117_v24 }
  0xa6   :  { %v96_v1 = vsub.s32 0, %v94_v0  ;;  %v123_v26 = vadd.s32 3, %v119_v25 }
  0xa8   :  { %v152_v2 = vmin.u32 %v96_v1, %v94_v0  ;;  %v124_v27 = vand.u32 3, %v123_v26 }
  0xaa   :  { %v98_v3 = vclz %v152_v2  ;;  %vm129_vm9 = vcmp.eq.s32.totalorder %v124_v27, 2  ;;  %vm126_vm10 = vcmp.eq.s32.totalorder %v124_v27, 0  ;;  %vm125_vm11 = vcmp.lt.s32.totalorder %v124_v27, 2 }
  0xac   :  { %v153_v4 = vadd.s32 4294967294, %v98_v3 }
  0xae   :  { %vm154_vm6 = vcmp.lt.s32.totalorder %v153_v4, 0 }
  0xaf   :  { %v101_v5 = vsel %vm154_vm6, 0, %v153_v4 }
  0xb0   :  { %v102_v9 = vsub.s32 32, %v101_v5  ;;  %v106_v10 = vsub.s32 4294967266, %v101_v5  ;;  %v103_v11 = vshll.u32 %v94_v0, %v101_v5 }
  0xb2   :  { %v104_v12 = vshrl.u32 %v86_v7, %v102_v9  ;;  %v107_v13 = vadd.s32 127, %v106_v10 }
  0xb4   :  { %v105_v14 = vor.u32 %v104_v12, %v103_v11  ;;  %v108_v15 = vshll.u32 %v107_v13, 23 }
  0xb6   :  { %v109_v16 = vor.u32 4788187, %v108_v15  ;;  %v112_v18 = vcvt.s32.f32 %v105_v14 }
  0xb8   :  { %v110_v17 = vand.u32 2147483647, %v109_v16 }
  0xba   :  { %v113_v19 = vmul.f32 %v112_v18, %v110_v17 }
  0xbc   :  { %v114_v20 = vxor.u32 2147483648, %v113_v19 }
  0xbe   :  { %v115_v22 = vsel %vm32_vm7, %v114_v20, %v113_v19 }
  0xbf   :  { %v118_v23 = vsel %vm31_vm8, %v226_v6, %v115_v22 }
  0xc0   :  { %168 = vcosq.f32 %v118_v23 }
  0xc1   :  { %170 = vsinq.f32 %v118_v23 }
  0xcd   :  { %v169_v28 = vpop.eup %168 }
  0xce   :  { %v171_v29 = vpop.eup %170  ;;  %v130_v30 = vxor.u32 2147483648, %v169_v28 }
  0xcf   :  { %v127_v31 = vxor.u32 2147483648, %v171_v29 }
  0xd0   :  { %v131_v32 = vsel %vm129_vm9, %v130_v30, %v171_v29 }
  0xd1   :  { %v128_v8 = vsel %vm126_vm10, %v169_v28, %v127_v31 }
  0xd2   :  { %v132_v33 = vsel %vm125_vm11, %v128_v8, %v131_v32 }
  0xd3   :  { %v133_v34 = vsel %vm122_vm12, nan, %v132_v33 }
  0xd4   :  { %134 = vst [vmem:[#allocation2] sm:$0xff] %v133_v34 }
  0xd5   :  { %183 = shalt.err (!%p180_p4)
}
  0xd6   :  { %144 = dma.vmem_to_hbm [thread:$0]  %s142_s1, 128, %s252_s2, [#allocation3]  }
  0xd7   :  { %192 = dma.done.wait [#allocation3], 128  }
  0xd8   :  { %193 = vsyncadd [#allocation3], 4294967168 }
  0xd9   :  { %148 = vsyncpa [#allocation3], 1 }

</bundles_post_ra>
